<compile_context>
chip_gen: v7x
topology: tpu7x:2x2x1
jax: 0.10.0
libtpu: 0.0.40
codegen_flags: <defaults>
</compile_context>

<pallas_src>
import jax
import jax.numpy as jnp
from jax.experimental import pallas as pl
from jax.experimental.pallas import tpu as pltpu


def _scale_kernel(x_ref, o_ref, *, scale):
    # Pure elementwise multiply on the VMEM tile (VPU).
    o_ref[...] = x_ref[...] * scale


_SMALL_BYTES = 2 * 1024 * 1024          # below this: single full-array block
_LANE = 512                             # lane-dense slab width (multiple of 128)
_TARGET_TILE_BYTES = 2 * 1024 * 1024    # ~2 MiB tiles -> ~8 MiB VMEM w/ dbl-buffer


def scale_forward(x, scale=30):
    """Compute x * scale with a Pallas TPU kernel. Matches PyTorch Scale.forward."""
    orig_shape = x.shape
    dtype = x.dtype
    n = x.size
    itemsize = jnp.dtype(dtype).itemsize

    kernel = lambda x_ref, o_ref: _scale_kernel(x_ref, o_ref, scale=scale)

    # --- Small inputs: one full-array block, zero padding, one grid step. ---
    if n * itemsize <= _SMALL_BYTES:
        return pl.pallas_call(
            kernel,
            out_shape=jax.ShapeDtypeStruct(orig_shape, dtype),
        )(x)

    # --- Large inputs: lane-dense 2-D slab, big tiles, parallel grid. ---
    lane = _LANE
    if n % lane == 0:
        rows = n // lane
        x2d = x.reshape(rows, lane)      # contiguous reshape: no HBM copy
        padded = False
    else:
        # Rare ragged case: pad only to the next lane multiple (< lane extra
        # elements), not to a full tile multiple.
        rows = pl.cdiv(n, lane)
        x2d = jnp.pad(x.reshape(-1), (0, rows * lane - n)).reshape(rows, lane)
        padded = True

    # Tile rows so each block is ~_TARGET_TILE_BYTES; keep a multiple of 32
    # sublanes (covers f32 / bf16 / int8 packing) and at least 8.
    tile_rows = _TARGET_TILE_BYTES // (lane * itemsize)
    tile_rows = max(8, min(tile_rows, rows))
    if tile_rows > 32:
        tile_rows = (tile_rows // 32) * 32

    grid = (pl.cdiv(rows, tile_rows),)   # ragged last block handled by Pallas

    out2d = pl.pallas_call(
        kernel,
        out_shape=jax.ShapeDtypeStruct((rows, lane), dtype),
        grid_spec=pltpu.PrefetchScalarGridSpec(
            num_scalar_prefetch=0,
            grid=grid,
            in_specs=[pl.BlockSpec((tile_rows, lane), lambda i: (i, 0))],
            out_specs=pl.BlockSpec((tile_rows, lane), lambda i: (i, 0)),
        ),
        compiler_params=pltpu.CompilerParams(
            dimension_semantics=("parallel",),
        ),
    )(x2d)

    if padded:
        return out2d.reshape(-1)[:n].reshape(orig_shape)
    return out2d.reshape(orig_shape)     # contiguous reshape: no HBM copy


if __name__ == "__main__":
    key = jax.random.PRNGKey(0)
    scale = 30

    # NCHW input, small shapes: batch=2, channels=4, spatial=16x16 (small path).
    x = jax.random.normal(key, (2, 4, 16, 16), dtype=jnp.float32)
    y = jax.block_until_ready(scale_forward(x, scale))
    y_ref = x * scale
    assert y.shape == x.shape and y.dtype == x.dtype
    assert jnp.allclose(y, y_ref, atol=0.0, rtol=0.0), "mismatch vs reference (small)"

    # Exercise the tiled large-input path as well (16 MiB f32).
    x2 = jax.random.normal(jax.random.PRNGKey(1), (2048, 2048), dtype=jnp.float32)
    y2 = jax.block_until_ready(scale_forward(x2, scale))
    assert y2.shape == x2.shape and y2.dtype == x2.dtype
    assert jnp.allclose(y2, x2 * scale, atol=0.0, rtol=0.0), "mismatch vs reference (large)"

    print("KERNEL_OK")
</pallas_src>

<mosaic_0001>
module attributes {stable_mosaic.version = 11 : i64} {
  func.func @_lambda_(%arg0: memref<2x4x16x16xf32, #tpu.memory_space<vmem>>, %arg1: memref<2x4x16x16xf32, #tpu.memory_space<vmem>>) attributes {dimension_semantics = [], scalar_prefetch = 0 : i64, scratch_operands = 0 : i64, tpu.core_type = #tpu.core_type<tc>} {
    %c0 = arith.constant 0 : index
    %c0_0 = arith.constant 0 : index
    %c0_1 = arith.constant 0 : index
    %c0_2 = arith.constant 0 : index
    %0 = vector.load %arg0[%c0, %c0_0, %c0_1, %c0_2] : memref<2x4x16x16xf32, #tpu.memory_space<vmem>>, vector<2x4x16x16xf32>
    %cst = arith.constant 3.000000e+01 : f32
    %1 = vector.broadcast %cst : f32 to vector<2x4x16x16xf32>
    %2 = arith.mulf %0, %1 : vector<2x4x16x16xf32>
    %c0_3 = arith.constant 0 : index
    %c0_4 = arith.constant 0 : index
    %c0_5 = arith.constant 0 : index
    %c0_6 = arith.constant 0 : index
    %3 = vector.load %arg1[%c0_3, %c0_4, %c0_5, %c0_6] : memref<2x4x16x16xf32, #tpu.memory_space<vmem>>, vector<2x4x16x16xf32>
    tpu.vector_store %arg1[%c0_3, %c0_4, %c0_5, %c0_6], %2 {strides = array<i32>} : memref<2x4x16x16xf32, #tpu.memory_space<vmem>>, vector<2x4x16x16xf32>,
    return
  }
}

</mosaic_0001>

<bundles_post_ra>
// kernel: tpu_custom_call.1
= control target key start
LH: loop header
LB: loop body
LE: loop exit
PB: predicated region body
PF: predicated region fallthrough
CT: control target
= control target key end

     0   :  { %6 = vsyncpa [#allocation3], 0  ;;  %s204_s0 = inlined_call_operand.hbm [shape: f32[2,4,16,16], index: 0, kind: input, shape index: {}]   ;;  %s205_s1 = inlined_call_operand.hbm [shape: f32[2,4,16,16], index: 1, kind: output, shape index: {}]  }
   0x1   :  { %7 = vsyncpa [#allocation4], 0  ;;  %s141_s6 = smov [#allocation2]   ;;  %s93_s10 = scalar_lea.hbm %s204_s0, 2048 }
   0x2   :  { %s13_s7 = sshll.u32 %s141_s6, 4  ;;  %p94_p0 = scmp.ne.s32.totalorder %s204_s0, %s93_s10  ;;  %s14_s7 = int_to_ptr.vmem [resolvable:$true] %s13_s7 }
   0x3   :  { %p97_p1 = scmp.lt.u32.totalorder %s93_s10, %s204_s0 }
   0x5   :  { %p99_p2 = pnand %p97_p1, %p94_p0 }
   0x7   :  { %102 = shalt.err (!%p99_p2)
}
   0x8   :  { %s103_s15 = scalar_lea.vmem %s14_s7, 2048  ;;  %p108_p4 = scmp.lt.s32.totalorder %s14_s7, %s14_s7 }
   0x9   :  { %p104_p3 = scmp.ne.s32.totalorder %s14_s7, %s103_s15  ;;  %p109_p5 = scmp.lt.s32.totalorder %s103_s15, %s103_s15 }
   0xb   :  { %p110_p6 = por %p109_p5, %p108_p4 }
   0xd   :  { %p111_p7 = pnand %p110_p6, %p104_p3 }
   0xf   :  { %114 = shalt.err (!%p111_p7)
}
  0x10   :  { %s142_s16 = smov 128   ;;  %s143_s17 = smov 8  }
  0x11   :  { %19 = dma.hbm_to_vmem [thread:$0]  %s204_s0, 2048, %s14_s7, [#allocation3], %s142_s16, %s142_s16, %s143_s17  }
  0x12   :  { %137 = dma.done.wait [#allocation3], 2048  }
  0x13   :  { %138 = vsyncadd [#allocation3], 4294965248  ;;  %v23_v0 = vld [vmem:[#allocation2] sm:$0xff]  ;;  %vm55_vm0 = vcmask 130048   ;;  %v24_v1 = vld [vmem:[#allocation2 + $0x8] sm:$0xff]  ;;  %s144_s20 = smov [#allocation5]  }
  0x14   :  { %v25_v2 = vld [vmem:[#allocation2 + $0x10] sm:$0xff]  ;;  %s170_s21 = sshll.u32 %s144_s20, 4  ;;  %v39_v3 = vmul.f32 30.0, %v23_v0  ;;  %v40_v4 = vmul.f32 30.0, %v24_v1  ;;  %v26_v6 = vld [vmem:[#allocation2 + $0x18] sm:$0xff]  ;;  %v27_v7 = vld [vmem:[#allocation2 + $0x20] sm:$0xff]  ;;  %s78_s21 = int_to_ptr.vmem [resolvable:$true] %s170_s21 }
  0x15   :  { %v41_v5 = vmul.f32 30.0, %v25_v2  ;;  %v28_v8 = vld [vmem:[#allocation2 + $0x28] sm:$0xff]  ;;  %v42_v9 = vmul.f32 30.0, %v26_v6  ;;  %v43_v10 = vmul.f32 30.0, %v27_v7  ;;  %v29_v12 = vld [vmem:[#allocation2 + $0x30] sm:$0xff]  ;;  %v30_v13 = vld [vmem:[#allocation2 + $0x38] sm:$0xff]  ;;  %p120_p9 = scmp.lt.s32.totalorder %s78_s21, %s78_s21 }
  0x16   :  { %v44_v11 = vmul.f32 30.0, %v28_v8  ;;  %v31_v14 = vld [vmem:[#allocation2 + $0x40] sm:$0xff]  ;;  %56 = vst.msk [vmem:[#allocation5] sm:$0xff] %vm55_vm0, %v39_v3  ;;  %57 = vst.msk [vmem:[#allocation5 + $0x8] sm:$0xff] %vm55_vm0, %v40_v4  ;;  %v45_v15 = vmul.f32 30.0, %v29_v12  ;;  %v46_v16 = vmul.f32 30.0, %v30_v13 }
  0x17   :  { %58 = vst.msk [vmem:[#allocation5 + $0x10] sm:$0xff] %vm55_vm0, %v41_v5  ;;  %v47_v17 = vmul.f32 30.0, %v31_v14  ;;  %v32_v18 = vld [vmem:[#allocation2 + $0x48] sm:$0xff]  ;;  %v33_v19 = vld [vmem:[#allocation2 + $0x50] sm:$0xff]  ;;  %v34_v20 = vld [vmem:[#allocation2 + $0x58] sm:$0xff]  ;;  %s115_s0 = scalar_lea.vmem %s78_s21, 2048 }
  0x18   :  { %59 = vst.msk [vmem:[#allocation5 + $0x18] sm:$0xff] %vm55_vm0, %v42_v9  ;;  %60 = vst.msk [vmem:[#allocation5 + $0x20] sm:$0xff] %vm55_vm0, %v43_v10  ;;  %v48_v21 = vmul.f32 30.0, %v32_v18  ;;  %v49_v22 = vmul.f32 30.0, %v33_v19  ;;  %v50_v23 = vmul.f32 30.0, %v34_v20  ;;  %v35_v24 = vld [vmem:[#allocation2 + $0x60] sm:$0xff]  ;;  %p116_p8 = scmp.ne.s32.totalorder %s78_s21, %s115_s0  ;;  %p121_p10 = scmp.lt.s32.totalorder %s115_s0, %s115_s0 }
  0x19   :  { %61 = vst.msk [vmem:[#allocation5 + $0x28] sm:$0xff] %vm55_vm0, %v44_v11  ;;  %v36_v25 = vld [vmem:[#allocation2 + $0x68] sm:$0xff]  ;;  %v37_v26 = vld [vmem:[#allocation2 + $0x70] sm:$0xff]  ;;  %62 = vst.msk [vmem:[#allocation5 + $0x30] sm:$0xff] %vm55_vm0, %v45_v15  ;;  %v51_v27 = vmul.f32 30.0, %v35_v24 }
  0x1a   :  { %63 = vst.msk [vmem:[#allocation5 + $0x38] sm:$0xff] %vm55_vm0, %v46_v16  ;;  %64 = vst.msk [vmem:[#allocation5 + $0x40] sm:$0xff] %vm55_vm0, %v47_v17  ;;  %v52_v28 = vmul.f32 30.0, %v36_v25  ;;  %v53_v29 = vmul.f32 30.0, %v37_v26  ;;  %v38_v30 = vld [vmem:[#allocation2 + $0x78] sm:$0xff]  ;;  %p122_p11 = por %p121_p10, %p120_p9 }
  0x1b   :  { %65 = vst.msk [vmem:[#allocation5 + $0x48] sm:$0xff] %vm55_vm0, %v48_v21  ;;  %66 = vst.msk [vmem:[#allocation5 + $0x50] sm:$0xff] %vm55_vm0, %v49_v22  ;;  %v54_v31 = vmul.f32 30.0, %v38_v30 }
  0x1c   :  { %67 = vst.msk [vmem:[#allocation5 + $0x58] sm:$0xff] %vm55_vm0, %v50_v23  ;;  %68 = vst.msk [vmem:[#allocation5 + $0x60] sm:$0xff] %vm55_vm0, %v51_v27  ;;  %p123_p12 = pnand %p122_p11, %p116_p8 }
  0x1d   :  { %69 = vst.msk [vmem:[#allocation5 + $0x68] sm:$0xff] %vm55_vm0, %v52_v28  ;;  %70 = vst.msk [vmem:[#allocation5 + $0x70] sm:$0xff] %vm55_vm0, %v53_v29 }
  0x1e   :  { %71 = vst.msk [vmem:[#allocation5 + $0x78] sm:$0xff] %vm55_vm0, %v54_v31 }
  0x1f   :  { %126 = shalt.err (!%p123_p12)
}
  0x20   :  { %s127_s24 = scalar_lea.hbm %s205_s1, 2048 }
  0x21   :  { %p128_p13 = scmp.ne.s32.totalorder %s205_s1, %s127_s24  ;;  %p131_p0 = scmp.lt.u32.totalorder %s127_s24, %s205_s1 }
  0x23   :  { %p133_p1 = pnand %p131_p0, %p128_p13 }
  0x25   :  { %136 = shalt.err (!%p133_p1)
}
  0x26   :  { %83 = dma.vmem_to_hbm [thread:$0]  %s78_s21, 2048, %s205_s1, [#allocation4], %s142_s16, %s142_s16, %s143_s17  }
  0x27   :  { %139 = dma.done.wait [#allocation4], 2048  }
  0x28   :  { %140 = vsyncadd [#allocation4], 4294965248 }
  0x29   :  { %87 = vsyncpa [#allocation3], 1 }
  0x2a   :  { %88 = vsyncpa [#allocation4], 1 }

</bundles_post_ra>
